<compile_context>
chip_gen: v5e
topology: v5e:2x2
jax: 0.10.0
libtpu: 0.0.40
codegen_flags: <defaults>
</compile_context>

<pallas_src>
import functools

import jax
import jax.numpy as jnp
from jax.experimental import pallas as pl
from jax.experimental.pallas import tpu as pltpu


def _round_up(x: int, m: int) -> int:
    return ((x + m - 1) // m) * m


def _autoencoder_kernel(x_ref, w1_ref, b1_ref, w2_ref, b2_ref, o_ref):
    # Cast x to bf16 in-kernel (VPU has slack; saves an HBM pass in the wrapper).
    x_lo = x_ref[...].astype(jnp.bfloat16)
    # Encoder: Linear (bf16 operands, f32 accumulate on MXU) + bias + ReLU (f32).
    h = jnp.dot(x_lo, w1_ref[...], preferred_element_type=jnp.float32)
    h = jnp.maximum(h + b1_ref[...], 0.0)            # [tb, H] + [1, H] broadcast
    # Decoder: Linear (activations back to bf16 for the MXU) + bias + Sigmoid.
    y = jnp.dot(h.astype(w2_ref.dtype), w2_ref[...],
                preferred_element_type=jnp.float32)
    y = y + b2_ref[...]                               # [tb, D_out] + [1, D_out]
    # sigmoid(y) = 1 / (1 + exp(-y)): exp on EUP, approx reciprocal on EUP
    # (no exact divide).
    sig = pl.reciprocal(1.0 + jnp.exp(-y), approx=True)
    o_ref[...] = sig.astype(o_ref.dtype)


def prepare_params(w1, b1, w2, b2):
    """One-time parameter prep (hoisted out of the per-call forward).

    Casts weights to bf16 for the MXU, keeps biases f32 for the epilogue, and
    zero-pads the output-feature axis only when it is large and not a multiple
    of 128 (lane-dense stores). Returns (w1, b1, w2, b2, d_out).
    """
    d_out = w2.shape[1]
    w1 = jnp.asarray(w1, jnp.bfloat16)
    w2 = jnp.asarray(w2, jnp.bfloat16)
    b1 = jnp.asarray(b1, jnp.float32)
    b2 = jnp.asarray(b2, jnp.float32)
    if d_out > 128 and d_out % 128 != 0:
        pad = _round_up(d_out, 128) - d_out
        w2 = jnp.pad(w2, ((0, 0), (0, pad)))
        b2 = jnp.pad(b2, ((0, 0), (0, pad)))
    return w1, b1, w2, b2, d_out


@functools.partial(jax.jit, static_argnames=("d_out", "block_batch"))
def autoencoder_forward(x, w1, b1, w2, b2, *, d_out, block_batch=4096):
    """x: [B, D_in] (f32); w1: [D_in, H] bf16; b1: [1, H] f32;
    w2: [H, D_out_pad] bf16; b2: [1, D_out_pad] f32; d_out: original D_out."""
    B, D_in = x.shape
    H = w1.shape[1]
    d_out_p = w2.shape[1]

    out_dtype = x.dtype
    # Sublane packing: 16 rows/vreg for 16-bit output, 8 for 32-bit.
    sublane = 16 if jnp.dtype(out_dtype).itemsize == 2 else 8

    # Batch tile: multiple of `sublane`, capped by the requested tile size.
    tb = min(block_batch, _round_up(B, sublane))
    # Ensure >= 2 grid steps when the batch allows it, so the "parallel" axis
    # can shard across v7x's two TensorCores (no-op on v5e/v6e; per-step
    # overhead of the extra tile is negligible).
    if pl.cdiv(B, tb) < 2 and B >= 2 * sublane:
        tb = _round_up(-(-B // 2), sublane)
    grid = (pl.cdiv(B, tb),)

    out = pl.pallas_call(
        _autoencoder_kernel,
        out_shape=jax.ShapeDtypeStruct((B, d_out_p), out_dtype),
        grid_spec=pl.GridSpec(
            grid=grid,
            in_specs=[
                # x: streamed per batch tile (double-buffered by Pallas).
                pl.BlockSpec((tb, D_in), lambda i: (i, 0)),
                # Weights / biases: constant block index -> stay VMEM-resident.
                pl.BlockSpec((D_in, H), lambda i: (0, 0)),
                pl.BlockSpec((1, H), lambda i: (0, 0)),
                pl.BlockSpec((H, d_out_p), lambda i: (0, 0)),
                pl.BlockSpec((1, d_out_p), lambda i: (0, 0)),
            ],
            out_specs=pl.BlockSpec((tb, d_out_p), lambda i: (i, 0)),
        ),
        compiler_params=pltpu.CompilerParams(
            dimension_semantics=("parallel",)),  # batch tiles are independent
    )(x, w1, b1, w2, b2)

    if d_out_p != d_out:
        out = out[:, :d_out]
    return out


def _init_linear(key, fan_in, fan_out, dtype=jnp.float32):
    """Matches PyTorch nn.Linear default init: U(-1/sqrt(fan_in), 1/sqrt(fan_in)).

    Returns (W [fan_in, fan_out], b [1, fan_out]) — W is the transpose of
    PyTorch's stored [out, in] weight so the kernel computes x @ W.
    """
    kw, kb = jax.random.split(key)
    bound = 1.0 / jnp.sqrt(jnp.array(fan_in, dtype))
    w = jax.random.uniform(kw, (fan_in, fan_out), dtype, -bound, bound)
    b = jax.random.uniform(kb, (1, fan_out), dtype, -bound, bound)
    return w, b


def _reference_forward_bf16(x, w1, b1, w2, b2):
    """Pure-JAX reference mirroring the kernel's bf16-operand / f32-accumulate math."""
    h = jnp.dot(x.astype(jnp.bfloat16), w1.astype(jnp.bfloat16),
                preferred_element_type=jnp.float32)
    h = jnp.maximum(h + b1, 0.0)
    y = jnp.dot(h.astype(jnp.bfloat16), w2.astype(jnp.bfloat16),
                preferred_element_type=jnp.float32)
    return jax.nn.sigmoid(y + b2)


def _reference_forward_f32(x, w1, b1, w2, b2):
    h = jnp.maximum(x @ w1 + b1, 0.0)
    return jax.nn.sigmoid(h @ w2 + b2)


if __name__ == "__main__":
    # layer_sizes = (input, hidden, output) as in Autoencoder.__init__
    layer_sizes = (32, 16, 32)
    batch = 8

    key = jax.random.PRNGKey(0)
    k_x, k_enc, k_dec = jax.random.split(key, 3)

    x = jax.random.normal(k_x, (batch, layer_sizes[0]), jnp.float32)
    w1, b1 = _init_linear(k_enc, layer_sizes[0], layer_sizes[1])
    w2, b2 = _init_linear(k_dec, layer_sizes[1], layer_sizes[2])

    # One-time parameter preparation (bf16 weights, f32 biases, optional pad).
    pw1, pb1, pw2, pb2, d_out = prepare_params(w1, b1, w2, b2)

    out = autoencoder_forward(x, pw1, pb1, pw2, pb2, d_out=d_out)
    out = jax.block_until_ready(out)
    assert out.shape == (batch, layer_sizes[2])
    assert out.dtype == x.dtype

    # Exact-path check vs. bf16-operand reference (same math as the kernel;
    # approx-reciprocal sigmoid adds ~1e-4 relative error at most).
    ref_bf16 = _reference_forward_bf16(x, w1, b1, w2, b2)
    assert jnp.allclose(out, ref_bf16, atol=3e-3, rtol=3e-3), \
        "mismatch vs bf16-operand JAX reference"

    # Semantics check vs. full-f32 PyTorch-equivalent forward (bf16 rounding tolerance).
    ref_f32 = _reference_forward_f32(x, w1, b1, w2, b2)
    assert jnp.allclose(out, ref_f32, atol=5e-2, rtol=5e-2), \
        "mismatch vs f32 JAX reference"

    print("KERNEL_OK")
</pallas_src>

<mosaic_0001>
module attributes {stable_mosaic.version = 11 : i64} {
  func.func @_autoencoder_kernel(%arg0: i32, %arg1: memref<8x32xf32, #tpu.memory_space<vmem>>, %arg2: memref<32x16xbf16, #tpu.memory_space<vmem>>, %arg3: memref<1x16xf32, #tpu.memory_space<vmem>>, %arg4: memref<16x32xbf16, #tpu.memory_space<vmem>>, %arg5: memref<1x32xf32, #tpu.memory_space<vmem>>, %arg6: memref<8x32xf32, #tpu.memory_space<vmem>>) attributes {dimension_semantics = [#tpu.dimension_semantics<parallel>], iteration_bounds = array<i64: 1>, scalar_prefetch = 0 : i64, scratch_operands = 0 : i64, tpu.core_type = #tpu.core_type<tc>, window_params = [{transform_indices = @transform_0, window_bounds = array<i64: 8, 32>}, {pipeline_mode = #tpu.pipeline_mode<synchronous>, transform_indices = @transform_1, window_bounds = array<i64: 32, 16>}, {pipeline_mode = #tpu.pipeline_mode<synchronous>, transform_indices = @transform_2, window_bounds = array<i64: 1, 16>}, {pipeline_mode = #tpu.pipeline_mode<synchronous>, transform_indices = @transform_3, window_bounds = array<i64: 16, 32>}, {pipeline_mode = #tpu.pipeline_mode<synchronous>, transform_indices = @transform_4, window_bounds = array<i64: 1, 32>}, {transform_indices = @transform_5, window_bounds = array<i64: 8, 32>}]} {
    %c0 = arith.constant 0 : index
    %c0_0 = arith.constant 0 : index
    %0 = vector.load %arg1[%c0, %c0_0] : memref<8x32xf32, #tpu.memory_space<vmem>>, vector<8x32xf32>
    %1 = arith.truncf %0 : vector<8x32xf32> to vector<8x32xbf16>
    %c0_1 = arith.constant 0 : index
    %c0_2 = arith.constant 0 : index
    %2 = vector.load %arg2[%c0_1, %c0_2] : memref<32x16xbf16, #tpu.memory_space<vmem>>, vector<32x16xbf16>
    %cst = arith.constant dense<0.000000e+00> : vector<8x16xf32>
    %3 = tpu.matmul %1, %2, %cst {dimension_numbers = #tpu.dot_dimension_numbers<[1], [0], [0], [1], [0, 0, 1, 1], [], []>} : vector<8x32xbf16>, vector<32x16xbf16>, vector<8x16xf32> -> vector<8x16xf32>
    %c0_3 = arith.constant 0 : index
    %c0_4 = arith.constant 0 : index
    %4 = vector.load %arg3[%c0_3, %c0_4] : memref<1x16xf32, #tpu.memory_space<vmem>>, vector<1x16xf32>
    %5 = vector.broadcast %4 : vector<1x16xf32> to vector<8x16xf32>
    %6 = arith.addf %3, %5 : vector<8x16xf32>
    %cst_5 = arith.constant 0.000000e+00 : f32
    %7 = vector.broadcast %cst_5 : f32 to vector<8x16xf32>
    %8 = arith.maximumf %6, %7 : vector<8x16xf32>
    %9 = arith.truncf %8 : vector<8x16xf32> to vector<8x16xbf16>
    %c0_6 = arith.constant 0 : index
    %c0_7 = arith.constant 0 : index
    %10 = vector.load %arg4[%c0_6, %c0_7] : memref<16x32xbf16, #tpu.memory_space<vmem>>, vector<16x32xbf16>
    %cst_8 = arith.constant dense<0.000000e+00> : vector<8x32xf32>
    %11 = tpu.matmul %9, %10, %cst_8 {dimension_numbers = #tpu.dot_dimension_numbers<[1], [0], [0], [1], [0, 0, 1, 1], [], []>} : vector<8x16xbf16>, vector<16x32xbf16>, vector<8x32xf32> -> vector<8x32xf32>
    %c0_9 = arith.constant 0 : index
    %c0_10 = arith.constant 0 : index
    %12 = vector.load %arg5[%c0_9, %c0_10] : memref<1x32xf32, #tpu.memory_space<vmem>>, vector<1x32xf32>
    %13 = vector.broadcast %12 : vector<1x32xf32> to vector<8x32xf32>
    %14 = arith.addf %11, %13 : vector<8x32xf32>
    %cst_11 = arith.constant 0.000000e+00 : f32
    %15 = vector.broadcast %cst_11 : f32 to vector<8x32xf32>
    %16 = arith.subf %15, %14 : vector<8x32xf32>
    %17 = math.exp %16 : vector<8x32xf32>
    %cst_12 = arith.constant 1.000000e+00 : f32
    %18 = vector.broadcast %cst_12 : f32 to vector<8x32xf32>
    %19 = arith.addf %18, %17 : vector<8x32xf32>
    %20 = tpu.reciprocal %19 {approx = true} : vector<8x32xf32> -> vector<8x32xf32>
    %c0_13 = arith.constant 0 : index
    %c0_14 = arith.constant 0 : index
    %21 = vector.load %arg6[%c0_13, %c0_14] : memref<8x32xf32, #tpu.memory_space<vmem>>, vector<8x32xf32>
    tpu.vector_store %arg6[%c0_13, %c0_14], %20 {strides = array<i32>} : memref<8x32xf32, #tpu.memory_space<vmem>>, vector<8x32xf32>,
    return
  }
  func.func @transform_0(%arg0: i32) -> (i32, i32) {
    %c0_i32 = arith.constant 0 : i32
    %c0_i32_0 = arith.constant 0 : i32
    return %arg0, %c0_i32 : i32, i32
  }
  func.func @transform_1(%arg0: i32) -> (i32, i32) {
    %c0_i32 = arith.constant 0 : i32
    %c0_i32_0 = arith.constant 0 : i32
    %c0_i32_1 = arith.constant 0 : i32
    return %c0_i32, %c0_i32_0 : i32, i32
  }
  func.func @transform_2(%arg0: i32) -> (i32, i32) {
    %c0_i32 = arith.constant 0 : i32
    %c0_i32_0 = arith.constant 0 : i32
    %c0_i32_1 = arith.constant 0 : i32
    return %c0_i32, %c0_i32_0 : i32, i32
  }
  func.func @transform_3(%arg0: i32) -> (i32, i32) {
    %c0_i32 = arith.constant 0 : i32
    %c0_i32_0 = arith.constant 0 : i32
    %c0_i32_1 = arith.constant 0 : i32
    return %c0_i32, %c0_i32_0 : i32, i32
  }
  func.func @transform_4(%arg0: i32) -> (i32, i32) {
    %c0_i32 = arith.constant 0 : i32
    %c0_i32_0 = arith.constant 0 : i32
    %c0_i32_1 = arith.constant 0 : i32
    return %c0_i32, %c0_i32_0 : i32, i32
  }
  func.func @transform_5(%arg0: i32) -> (i32, i32) {
    %c0_i32 = arith.constant 0 : i32
    %c0_i32_0 = arith.constant 0 : i32
    return %arg0, %c0_i32 : i32, i32
  }
}

</mosaic_0001>

<bundles_post_ra>
// kernel: autoencoder_forward.1
= control target key start
LH: loop header
LB: loop body
LE: loop exit
PB: predicated region body
PF: predicated region fallthrough
CT: control target
= control target key end

     0   :  { %s218_s0 = inlined_call_operand.vmem [shape: f32[8,32], index: 0, kind: input, shape index: {}]   ;;  %s219_s1 = inlined_call_operand.vmem [shape: bf16[32,16], index: 1, kind: input, shape index: {}]   ;;  %s220_s2 = inlined_call_operand.vmem [shape: f32[1,16], index: 2, kind: input, shape index: {}]   ;;  %s221_s3 = inlined_call_operand.vmem [shape: bf16[16,32], index: 3, kind: input, shape index: {}]   ;;  %s222_s4 = inlined_call_operand.vmem [shape: f32[1,32], index: 4, kind: input, shape index: {}]   ;;  %s223_s5 = inlined_call_operand.hbm [shape: f32[8,32], index: 5, kind: output, shape index: {}]  }
   0x1   :  { %v129_v0 = vld [vmem:[%s219_s1 + $0x8] sm:$0xff]  ;;  %v128_v1 = vld [vmem:[%s219_s1] sm:$0xff] }
   0x2   :  { %54 = vmatpush.bf16.msra.mxu0 %v129_v0  ;;  %v22_v2 = vld [vmem:[%s218_s0] sm:$0xff] }
   0x3   :  { %10 = vsyncpa [#allocation3], 0  ;;  %v23_v3 = vpack.c.bf16 %v22_v2, %v22_v2  ;;  %vm44_vm0 = vcmask 261120   ;;  %v130_v4 = vld [vmem:[%s221_s3] sm:$0xff]  ;;  %vm75_vm1 = vcmask 130048   ;;  %s105_s30 = sshll.u32 %s223_s5, 4  ;;  %s106_s30 = int_to_ptr.hbm [resolvable:$true] %s105_s30 }
   0x4   :  { %86 = vmatpush.bf16.msra.mxu1 %v130_v4  ;;  %v132_v5 = vld [vmem:[%s220_s2] ss:$0 sm:$0xff]  ;;  %s164_s2 = smov [#allocation2]  }
   0x5   :  { %v133_v11 = vld [vmem:[%s222_s4] ss:$0 sm:$0xff]  ;;  %s103_s3 = sshll.u32 %s164_s2, 4  ;;  %s104_s3 = int_to_ptr.vmem [resolvable:$true] %s103_s3 }
   0x6   :  { %55 = vmatpush.bf16.msra.mxu0 %v128_v1 }
   0x9   :  { %122 = vmatmul.msk.bf16.vlgmr.msra.gmra.mxu0 %vm44_vm0, %v23_v3 }
  0x86   :  { %v57_v6 = vpop.f32.mrf.mxu0 }
  0x87   :  { %v58_v7 = vadd.f32 %v132_v5, %v57_v6 }
  0x89   :  { %v61_v8 = vmax.f32 %v58_v7, 0.0 }
  0x8b   :  { %v62_v9 = vpack.c.bf16 %v61_v8, %v61_v8 }
  0x8d   :  { %127 = vmatmul.msk.bf16.vlgmr.msra.gmra.mxu1 %vm75_vm1, %v62_v9 }
  0x8e   :  { %v59_v10 = vpop.f32.mrf.mxu0 }
 0x10a   :  { %v88_v12 = vpop.f32.mrf.mxu1 }
 0x10b   :  { %v89_v13 = vadd.f32 %v133_v11, %v88_v12 }
 0x10d   :  { %v92_v14 = vsub.f32 0.0, %v89_v13 }
 0x10f   :  { %v93_v15 = vmul.f32 1.442695, %v92_v14 }
 0x111   :  { %134 = vpow2.f32 %v93_v15 }
 0x112   :  { %v90_v16 = vpop.f32.mrf.mxu1 }
 0x117   :  { %v135_v17 = vpop.eup %134 }
 0x118   :  { %v95_v18 = vadd.f32 1.0, %v135_v17 }
 0x11a   :  { %136 = vrcp.f32 %v95_v18 }
 0x120   :  { %v137_v19 = vpop.eup %136 }
 0x121   :  { %97 = vst.msk [vmem:[#allocation2] sm:$0xff] %vm44_vm0, %v137_v19 }
 0x122   :  { %108 = dma.vmem_to_hbm [thread:$0]  %s104_s3, 128, %s106_s30, [#allocation3]  }
 0x123   :  { %162 = dma.done.wait [#allocation3], 128  }
 0x124   :  { %163 = vsyncadd [#allocation3], 4294967168 }
 0x125   :  { %113 = vsyncpa [#allocation3], 1 }

</bundles_post_ra>
